<compile_context>
chip_gen: v6e
topology: v6e:2x2x1
jax: 0.10.0
libtpu: 0.0.40
codegen_flags: <defaults>
</compile_context>

<pallas_src>
import jax
import jax.numpy as jnp
import numpy as np
from jax import lax
from jax.experimental import pallas as pl
from jax.experimental.pallas import tpu as pltpu


def _inclusive_prefix_sum_rows(x):
    """Inclusive prefix sum along axis 0 of a [S, 1] int32 array.

    Hillis-Steele log-step scan (shift-down + add).  O(S log S) VPU work, no
    O(S^2) triangular matrix and no MXU involvement.
    """
    s = x.shape[0]
    y = x
    k = 1
    while k < s:
        shifted = jnp.concatenate(
            [jnp.zeros((k,) + x.shape[1:], x.dtype), y[: s - k]], axis=0)
        y = y + shifted
        k *= 2
    return y


def _pick_nms_kernel(sel_ref, boxes_ref, scores_ref, out_ref):
    # sel_ref   : [S, 3] int32  rows = [batch_index, label_index, box_index], pad = -1
    # boxes_ref : [1, N, 4]     this image's boxes
    # scores_ref: [1, N, C]     this image's scores
    # out_ref   : [1, 8, M] f32 slab (rows 0-3 boxes, 4 score, 5 class, 6 count, 7 pad)
    i = pl.program_id(0)
    S = sel_ref.shape[0]
    N = boxes_ref.shape[1]
    C = scores_ref.shape[2]
    M = out_ref.shape[2]

    sel_b = sel_ref[:, 0:1]                        # [S, 1] int32
    sel_lb = sel_ref[:, 1:3].astype(jnp.float32)   # [S, 2] f32  (label, box)

    # ---- per-image match mask & stable compaction slots (no [S,S] tri) ----------
    mask_b = sel_b == i                            # [S, 1] bool (pad rows: batch=-1)
    mask_i = mask_b.astype(jnp.int32)
    pref = _inclusive_prefix_sum_rows(mask_i)      # [S, 1] inclusive running count
    pos = pref - 1                                 # destination slot of each match
    cnt = jnp.sum(mask_i, axis=0, keepdims=True)   # [1, 1] num matches (may exceed M)

    slot_iota = lax.broadcasted_iota(jnp.int32, (S, M), 1)
    comp = jnp.where((pos == slot_iota) & mask_b, 1.0, 0.0)          # [S, M] scatter

    # ---- compact (label, box) indices into slot order: one [2, M] matmul --------
    contract0 = (((0,), (0,)), ((), ()))           # A^T @ B
    compact = lax.dot_general(sel_lb, comp, contract0,
                              preferred_element_type=jnp.float32)    # [2, M]
    label_row = compact[0:1, :]                    # [1, M] f32 (exact small ints)
    box_idx = compact[1:2, :].astype(jnp.int32)    # [1, M]

    # ---- gather boxes / scores for each output slot (M-lane-wide matmuls) -------
    # NOTE: with bf16 inputs these one-hot gathers could run natively on the bf16
    # MXU (one-hots are exact in bf16); kept in f32 so boxes/scores stay bit-exact.
    boxes_f = boxes_ref[0].astype(jnp.float32)     # [N, 4]
    scores_f = scores_ref[0].astype(jnp.float32)   # [N, C]

    n_iota = lax.broadcasted_iota(jnp.int32, (N, M), 0)
    onehot_n = jnp.where(n_iota == box_idx, 1.0, 0.0)                # [N, M]
    boxes_t = lax.dot_general(boxes_f, onehot_n, contract0,
                              preferred_element_type=jnp.float32)    # [4, M]
    scores_t = lax.dot_general(scores_f, onehot_n, contract0,
                               preferred_element_type=jnp.float32)   # [C, M]

    c_iota = lax.broadcasted_iota(jnp.int32, (C, M), 0)
    onehot_c = jnp.where(c_iota == label_row.astype(jnp.int32), 1.0, 0.0)   # [C, M]
    score_row = jnp.sum(scores_t * onehot_c, axis=0, keepdims=True)  # [1, M]

    # ---- mask empty slots (slot >= count) and assemble the lane-dense slab ------
    lane_iota = lax.broadcasted_iota(jnp.int32, (1, M), 1)
    valid = jnp.where(lane_iota < cnt, 1.0, 0.0)                     # [1, M]

    count_row = jnp.broadcast_to(cnt.astype(jnp.float32), (1, M))    # [1, M]
    pad_row = jnp.zeros((1, M), jnp.float32)
    out_ref[0] = jnp.concatenate(
        [boxes_t * valid, score_row * valid, label_row * valid, count_row, pad_row],
        axis=0)                                                      # [8, M]


def pick_nms_predictions_batched(pred_boxes, pred_scores, selected_indexes,
                                 max_predictions_per_image):
    B, N, _ = pred_boxes.shape
    C = pred_scores.shape[2]
    M = max_predictions_per_image
    S = B * M

    sel = jnp.asarray(selected_indexes, dtype=jnp.int32)
    n_sel = sel.shape[0]
    # mirrors torch.nn.functional.pad(..., value=-1) on the prediction rows
    sel_padded = jnp.pad(sel, ((0, S - n_sel), (0, 0)), constant_values=-1)

    slab = pl.pallas_call(
        _pick_nms_kernel,
        grid=(B,),
        in_specs=[
            pl.BlockSpec((S, 3), lambda i: (0, 0)),         # full selection table
            pl.BlockSpec((1, N, 4), lambda i: (i, 0, 0)),   # this image's boxes
            pl.BlockSpec((1, N, C), lambda i: (i, 0, 0)),   # this image's scores
        ],
        out_specs=pl.BlockSpec((1, 8, M), lambda i: (i, 0, 0)),
        out_shape=jax.ShapeDtypeStruct((B, 8, M), jnp.float32),
        compiler_params=pltpu.CompilerParams(
            dimension_semantics=("parallel",)),
    )(sel_padded, pred_boxes, pred_scores)

    # Layout plumbing only: split / transpose / cast the lane-dense slab.
    out_boxes = jnp.transpose(slab[:, 0:4, :], (0, 2, 1))            # [B, M, 4]
    out_scores = slab[:, 4, :]                                       # [B, M]
    out_classes = slab[:, 5, :].astype(jnp.int32)                    # [B, M]
    num_pred = slab[:, 6, 0:1].astype(jnp.int32)                     # [B, 1]
    # NOTE: num_predictions may exceed M (extra rows are dropped), matching torch.
    # TODO(synk): torch returns int64 for num_predictions / classes; JAX (x64 off) uses int32.
    return num_pred, out_boxes, out_scores, out_classes


def _reference_numpy(pred_boxes, pred_scores, selected_indexes, B, M):
    """Pure-numpy port of the torch forward for verification."""
    sel = np.asarray(selected_indexes)
    bi, li, ni = sel[:, 0], sel[:, 1], sel[:, 2]
    sel_boxes = pred_boxes[bi, ni]                                   # [n, 4]
    sel_scores = pred_scores[bi, ni, li]                             # [n]
    preds = np.concatenate(
        [bi[:, None].astype(np.float32), sel_boxes,
         sel_scores[:, None], li[:, None].astype(np.float32)], axis=1)
    pad_rows = M * B - preds.shape[0]
    preds = np.concatenate(
        [preds, np.full((pad_rows, 7), -1.0, np.float32)], axis=0)
    batch_preds = np.zeros((B, M, 6), np.float32)
    num = np.zeros((B,), np.int64)
    for i in range(B):
        m = preds[:, 0] == i
        num[i] = m.sum()
        sp = preds[m][:, 1:]
        batch_preds[i, : min(sp.shape[0], M)] = sp[:M]
        del sp
    return (num[:, None], batch_preds[:, :, 0:4],
            batch_preds[:, :, 4], batch_preds[:, :, 5].astype(np.int64))


if __name__ == "__main__":
    # small, deterministic shapes
    B = 2                       # batch_size
    N = 16                      # num_pre_nms_predictions
    C = 3                       # num classes
    M = 8                       # max_predictions_per_image

    key = jax.random.PRNGKey(0)
    k1, k2, k3, k4 = jax.random.split(key, 4)
    pred_boxes = jax.random.uniform(k1, (B, N, 4), dtype=jnp.float32)
    pred_scores = jax.random.uniform(k2, (B, N, C), dtype=jnp.float32)

    # deterministic "NMS plugin" output: [batch, label, box], per-batch counts <= M
    batch_idx = jnp.array([0, 1, 0, 0, 1, 1, 0, 1, 0, 1, 0], dtype=jnp.int32)
    n_sel = batch_idx.shape[0]
    label_idx = jax.random.randint(k3, (n_sel,), 0, C, dtype=jnp.int32)
    box_idx = jax.random.randint(k4, (n_sel,), 0, N, dtype=jnp.int32)
    selected_indexes = jnp.stack([batch_idx, label_idx, box_idx], axis=1)

    num_pred, out_boxes, out_scores, out_classes = jax.block_until_ready(
        pick_nms_predictions_batched(pred_boxes, pred_scores, selected_indexes, M))

    ref_num, ref_boxes, ref_scores, ref_classes = _reference_numpy(
        np.asarray(pred_boxes), np.asarray(pred_scores),
        np.asarray(selected_indexes), B, M)

    np.testing.assert_array_equal(np.asarray(num_pred), ref_num.astype(np.int32))
    np.testing.assert_allclose(np.asarray(out_boxes), ref_boxes, rtol=1e-5, atol=1e-5)
    np.testing.assert_allclose(np.asarray(out_scores), ref_scores, rtol=1e-5, atol=1e-5)
    np.testing.assert_array_equal(np.asarray(out_classes), ref_classes.astype(np.int32))

    print("KERNEL_OK")
</pallas_src>

<mosaic_0001>
module attributes {stable_mosaic.version = 11 : i64} {
  func.func @_pick_nms_kernel(%arg0: i32, %arg1: memref<16x3xi32, #tpu.memory_space<vmem>>, %arg2: memref<1x16x4xf32, #tpu.memory_space<vmem>>, %arg3: memref<1x16x3xf32, #tpu.memory_space<vmem>>, %arg4: memref<1x8x8xf32, #tpu.memory_space<vmem>>) attributes {dimension_semantics = [#tpu.dimension_semantics<parallel>], iteration_bounds = array<i64: 2>, scalar_prefetch = 0 : i64, scratch_operands = 0 : i64, tpu.core_type = #tpu.core_type<tc>, window_params = [{pipeline_mode = #tpu.pipeline_mode<synchronous>, transform_indices = @transform_0, window_bounds = array<i64: 16, 3>}, {transform_indices = @transform_1, window_bounds = array<i64: 1, 16, 4>}, {transform_indices = @transform_2, window_bounds = array<i64: 1, 16, 3>}, {transform_indices = @transform_3, window_bounds = array<i64: 1, 8, 8>}]} {
    %c0 = arith.constant 0 : index
    %c0_0 = arith.constant 0 : index
    %0 = vector.load %arg1[%c0, %c0_0] : memref<16x3xi32, #tpu.memory_space<vmem>>, vector<16x1xi32>
    %c0_1 = arith.constant 0 : index
    %c1 = arith.constant 1 : index
    %1 = vector.load %arg1[%c0_1, %c1] : memref<16x3xi32, #tpu.memory_space<vmem>>, vector<16x2xi32>
    %2 = arith.sitofp %1 : vector<16x2xi32> to vector<16x2xf32>
    %3 = vector.broadcast %arg0 : i32 to vector<16x1xi32>
    %4 = arith.cmpi eq, %0, %3 : vector<16x1xi32>
    %5 = arith.extui %4 : vector<16x1xi1> to vector<16x1xi32>
    %c0_i32 = arith.constant 0 : i32
    %6 = vector.broadcast %c0_i32 : i32 to vector<1x1xi32>
    %7 = vector.extract_strided_slice %5 {offsets = [0, 0], sizes = [15, 1], strides = [1, 1]} : vector<16x1xi32> to vector<15x1xi32>
    %8 = tpu.concatenate %6, %7 in 0 : vector<1x1xi32>, vector<15x1xi32> -> vector<16x1xi32>
    %9 = arith.addi %5, %8 : vector<16x1xi32>
    %c0_i32_2 = arith.constant 0 : i32
    %10 = vector.broadcast %c0_i32_2 : i32 to vector<2x1xi32>
    %11 = vector.extract_strided_slice %9 {offsets = [0, 0], sizes = [14, 1], strides = [1, 1]} : vector<16x1xi32> to vector<14x1xi32>
    %12 = tpu.concatenate %10, %11 in 0 : vector<2x1xi32>, vector<14x1xi32> -> vector<16x1xi32>
    %13 = arith.addi %9, %12 : vector<16x1xi32>
    %c0_i32_3 = arith.constant 0 : i32
    %14 = vector.broadcast %c0_i32_3 : i32 to vector<4x1xi32>
    %15 = vector.extract_strided_slice %13 {offsets = [0, 0], sizes = [12, 1], strides = [1, 1]} : vector<16x1xi32> to vector<12x1xi32>
    %16 = tpu.concatenate %14, %15 in 0 : vector<4x1xi32>, vector<12x1xi32> -> vector<16x1xi32>
    %17 = arith.addi %13, %16 : vector<16x1xi32>
    %c0_i32_4 = arith.constant 0 : i32
    %18 = vector.broadcast %c0_i32_4 : i32 to vector<8x1xi32>
    %19 = vector.extract_strided_slice %17 {offsets = [0, 0], sizes = [8, 1], strides = [1, 1]} : vector<16x1xi32> to vector<8x1xi32>
    %20 = tpu.concatenate %18, %19 in 0 : vector<8x1xi32>, vector<8x1xi32> -> vector<16x1xi32>
    %21 = arith.addi %17, %20 : vector<16x1xi32>
    %c1_i32 = arith.constant 1 : i32
    %22 = vector.broadcast %c1_i32 : i32 to vector<16x1xi32>
    %23 = arith.subi %21, %22 : vector<16x1xi32>
    %cst = arith.constant dense<0> : vector<1xi32>
    %24 = vector.multi_reduction <add>, %5, %cst [0] : vector<16x1xi32> to vector<1xi32>
    %25 = vector.shape_cast %24 : vector<1xi32> to vector<1x1xi32>
    %26 = tpu.iota {dimensions = array<i32: 1>} : vector<16x8xi32>
    %27 = vector.broadcast %23 : vector<16x1xi32> to vector<16x8xi32>
    %28 = arith.cmpi eq, %27, %26 : vector<16x8xi32>
    %29 = vector.broadcast %4 : vector<16x1xi1> to vector<16x8xi1>
    %30 = arith.andi %28, %29 : vector<16x8xi1>
    %cst_5 = arith.constant 1.000000e+00 : f32
    %cst_6 = arith.constant 0.000000e+00 : f32
    %31 = vector.broadcast %cst_5 : f32 to vector<16x8xf32>
    %32 = vector.broadcast %cst_6 : f32 to vector<16x8xf32>
    %33 = arith.select %30, %31, %32 : vector<16x8xi1>, vector<16x8xf32>
    %cst_7 = arith.constant dense<0.000000e+00> : vector<2x8xf32>
    %34 = tpu.matmul %2, %33, %cst_7 {dimension_numbers = #tpu.dot_dimension_numbers<[0], [0], [1], [1], [0, 1, 1, 1], [], []>} : vector<16x2xf32>, vector<16x8xf32>, vector<2x8xf32> -> vector<2x8xf32>
    %35 = vector.extract_strided_slice %34 {offsets = [0, 0], sizes = [1, 8], strides = [1, 1]} : vector<2x8xf32> to vector<1x8xf32>
    %36 = vector.extract_strided_slice %34 {offsets = [1, 0], sizes = [1, 8], strides = [1, 1]} : vector<2x8xf32> to vector<1x8xf32>
    %37 = arith.fptosi %36 : vector<1x8xf32> to vector<1x8xi32>
    %c0_8 = arith.constant 0 : index
    %c0_9 = arith.constant 0 : index
    %c0_10 = arith.constant 0 : index
    %38 = vector.load %arg2[%c0_8, %c0_9, %c0_10] : memref<1x16x4xf32, #tpu.memory_space<vmem>>, vector<1x16x4xf32>
    %39 = vector.shape_cast %38 : vector<1x16x4xf32> to vector<16x4xf32>
    %c0_11 = arith.constant 0 : index
    %c0_12 = arith.constant 0 : index
    %c0_13 = arith.constant 0 : index
    %40 = vector.load %arg3[%c0_11, %c0_12, %c0_13] : memref<1x16x3xf32, #tpu.memory_space<vmem>>, vector<1x16x3xf32>
    %41 = vector.shape_cast %40 : vector<1x16x3xf32> to vector<16x3xf32>
    %42 = tpu.iota {dimensions = array<i32: 0>} : vector<16x8xi32>
    %43 = vector.broadcast %37 : vector<1x8xi32> to vector<16x8xi32>
    %44 = arith.cmpi eq, %42, %43 : vector<16x8xi32>
    %cst_14 = arith.constant 1.000000e+00 : f32
    %cst_15 = arith.constant 0.000000e+00 : f32
    %45 = vector.broadcast %cst_14 : f32 to vector<16x8xf32>
    %46 = vector.broadcast %cst_15 : f32 to vector<16x8xf32>
    %47 = arith.select %44, %45, %46 : vector<16x8xi1>, vector<16x8xf32>
    %cst_16 = arith.constant dense<0.000000e+00> : vector<4x8xf32>
    %48 = tpu.matmul %39, %47, %cst_16 {dimension_numbers = #tpu.dot_dimension_numbers<[0], [0], [1], [1], [0, 1, 1, 1], [], []>} : vector<16x4xf32>, vector<16x8xf32>, vector<4x8xf32> -> vector<4x8xf32>
    %cst_17 = arith.constant dense<0.000000e+00> : vector<3x8xf32>
    %49 = tpu.matmul %41, %47, %cst_17 {dimension_numbers = #tpu.dot_dimension_numbers<[0], [0], [1], [1], [0, 1, 1, 1], [], []>} : vector<16x3xf32>, vector<16x8xf32>, vector<3x8xf32> -> vector<3x8xf32>
    %50 = tpu.iota {dimensions = array<i32: 0>} : vector<3x8xi32>
    %51 = arith.fptosi %35 : vector<1x8xf32> to vector<1x8xi32>
    %52 = vector.broadcast %51 : vector<1x8xi32> to vector<3x8xi32>
    %53 = arith.cmpi eq, %50, %52 : vector<3x8xi32>
    %cst_18 = arith.constant 1.000000e+00 : f32
    %cst_19 = arith.constant 0.000000e+00 : f32
    %54 = vector.broadcast %cst_18 : f32 to vector<3x8xf32>
    %55 = vector.broadcast %cst_19 : f32 to vector<3x8xf32>
    %56 = arith.select %53, %54, %55 : vector<3x8xi1>, vector<3x8xf32>
    %57 = arith.mulf %49, %56 : vector<3x8xf32>
    %cst_20 = arith.constant dense<0.000000e+00> : vector<8xf32>
    %58 = vector.multi_reduction <add>, %57, %cst_20 [0] : vector<3x8xf32> to vector<8xf32>
    %59 = vector.shape_cast %58 : vector<8xf32> to vector<1x8xf32>
    %60 = tpu.iota {dimensions = array<i32: 1>} : vector<1x8xi32>
    %61 = vector.broadcast %25 : vector<1x1xi32> to vector<1x8xi32>
    %62 = arith.cmpi slt, %60, %61 : vector<1x8xi32>
    %cst_21 = arith.constant 1.000000e+00 : f32
    %cst_22 = arith.constant 0.000000e+00 : f32
    %63 = vector.broadcast %cst_21 : f32 to vector<1x8xf32>
    %64 = vector.broadcast %cst_22 : f32 to vector<1x8xf32>
    %65 = arith.select %62, %63, %64 : vector<1x8xi1>, vector<1x8xf32>
    %66 = arith.sitofp %25 : vector<1x1xi32> to vector<1x1xf32>
    %67 = vector.shape_cast %66 : vector<1x1xf32> to vector<1x1xf32>
    %68 = vector.broadcast %67 : vector<1x1xf32> to vector<1x8xf32>
    %cst_23 = arith.constant 0.000000e+00 : f32
    %69 = vector.broadcast %cst_23 : f32 to vector<1x8xf32>
    %70 = vector.broadcast %65 : vector<1x8xf32> to vector<4x8xf32>
    %71 = arith.mulf %48, %70 : vector<4x8xf32>
    %72 = arith.mulf %59, %65 : vector<1x8xf32>
    %73 = arith.mulf %35, %65 : vector<1x8xf32>
    %74 = tpu.concatenate %71, %72, %73, %68, %69 in 0 : vector<4x8xf32>, vector<1x8xf32>, vector<1x8xf32>, vector<1x8xf32>, vector<1x8xf32> -> vector<8x8xf32>
    %c0_24 = arith.constant 0 : index
    %c0_25 = arith.constant 0 : index
    %c0_26 = arith.constant 0 : index
    %75 = vector.load %arg4[%c0_24, %c0_25, %c0_26] : memref<1x8x8xf32, #tpu.memory_space<vmem>>, vector<1x8x8xf32>
    %76 = vector.shape_cast %75 : vector<1x8x8xf32> to vector<8x8xf32>
    %77 = vector.shape_cast %74 : vector<8x8xf32> to vector<1x8x8xf32>
    tpu.vector_store %arg4[%c0_24, %c0_25, %c0_26], %77 {strides = array<i32>} : memref<1x8x8xf32, #tpu.memory_space<vmem>>, vector<1x8x8xf32>,
    return
  }
  func.func @transform_0(%arg0: i32) -> (i32, i32) {
    %c0_i32 = arith.constant 0 : i32
    %c0_i32_0 = arith.constant 0 : i32
    %c0_i32_1 = arith.constant 0 : i32
    return %c0_i32, %c0_i32_0 : i32, i32
  }
  func.func @transform_1(%arg0: i32) -> (i32, i32, i32) {
    %c0_i32 = arith.constant 0 : i32
    %c0_i32_0 = arith.constant 0 : i32
    %c0_i32_1 = arith.constant 0 : i32
    return %arg0, %c0_i32, %c0_i32_0 : i32, i32, i32
  }
  func.func @transform_2(%arg0: i32) -> (i32, i32, i32) {
    %c0_i32 = arith.constant 0 : i32
    %c0_i32_0 = arith.constant 0 : i32
    %c0_i32_1 = arith.constant 0 : i32
    return %arg0, %c0_i32, %c0_i32_0 : i32, i32, i32
  }
  func.func @transform_3(%arg0: i32) -> (i32, i32, i32) {
    %c0_i32 = arith.constant 0 : i32
    %c0_i32_0 = arith.constant 0 : i32
    %c0_i32_1 = arith.constant 0 : i32
    return %arg0, %c0_i32, %c0_i32_0 : i32, i32, i32
  }
}

</mosaic_0001>

<bundles_post_ra>
// kernel: tpu_custom_call.1
= control target key start
LH: loop header
LB: loop body
LE: loop exit
PB: predicated region body
PF: predicated region fallthrough
CT: control target
= control target key end

     0   :  { %8 = vsyncpa [#allocation3], 0  ;;  %s1035_s0 = inlined_call_operand.vmem [shape: s32[16,3], index: 0, kind: input, shape index: {}]   ;;  %s1036_s1 = inlined_call_operand.vmem [shape: f32[2,16,4], index: 1, kind: input, shape index: {}]   ;;  %s1037_s2 = inlined_call_operand.vmem [shape: f32[2,16,3], index: 2, kind: input, shape index: {}]   ;;  %s1038_s3 = inlined_call_operand.hbm [shape: f32[2,8,8], index: 3, kind: output, shape index: {}]  }
   0x1   :  { %10 = vsyncpa [#allocation3 + $0x1], 0  ;;  %s912_s12 = smov 0   ;;  %s914_s13 = smov 0  }
   0x2   :  { %s916_s14 = smov 0   ;;  %s918_s15 = smov 0  }
   0x3 LB: > { %s933_s16 = sadd.s32 4294967295, %s884_s15   ;;  %s720_s17 = sadd.s32 4294967294, %s884_s15   ;;  %s884_s15 = sphi %s918_s15, %s1044_s15   ;;  %s880_s14 = sphi %s916_s14, %s1043_s14   ;;  %s876_s13 = sphi %s914_s13, %s1042_s13   ;;  %s872_s12 = sphi %s912_s12, %s1041_s12  }
   0x4   : > { %s937_s18 = sadd.s32 1, %s884_s15   ;;  %s96_s19 = sadd.s32 1, %s880_s14 }
   0x5   : > { %s93_s20 = ssub.s32 %s884_s15, %s937_s18  ;;  %p106_p0 = scmp.ne.s32.totalorder %s880_s14, %s876_s13 }
   0x6   : > { %p94_p1 = scmp.eq.s32.totalorder %s93_s20, 0  ;;  %p107_p2 = scmp.eq.s32.totalorder %s933_s16, 1 }
   0x7   : > { %p112_p3 = scmp.ne.s32.totalorder %s876_s13, %s872_s12  ;;  %p113_p4 = scmp.eq.s32.totalorder %s720_s17, 1 }
   0x8   : > { %s948_s21 = scalar_select %p94_p1, %s880_s14, %s96_s19  }
   0x9   : > { %p950_p5 = por %p107_p2, %p106_p0  ;;  %p954_p6 = por %p113_p4, %p112_p3 }
   0xa   : > { %p723_p7 = scmp.ge.s32.totalorder %s884_s15, 1  ;;  %p150_p8 = scmp.lt.s32.totalorder %s884_s15, 3 }
   0xc   : > { %p151_p9 = pnand %p723_p7, %p150_p8 }
   0xd   : > { %s887_s28 = smov (!%p151_p9), 127   ;;  %p179_p10 = scmp.lt.s32.totalorder (!%p151_p9), %s933_s16, 1 }
   0xe   : > { %154 = sbr.rel (%p151_p9) target bundleno = 692 (0x2b4), region = 32  ;;  %s176_s10 = sand.u32 (!%p151_p9), 1, %s876_s13  }
   0xf   : > { %s724_s11 = sshll.u32 (!%p151_p9), %s176_s10, 3  ;;  %s741_s17 = sshll.u32 (!%p151_p9), %s933_s16, 7 }
  0x10   : > { %s178_s19 = scalar_lea.vmem (!%p151_p9), [#allocation2], %s724_s11  ;;  %s1000_s26 = scalar_lea.hbm (!%p151_p9), %s1038_s3, %s741_s17 }
  0x11   : > { %s649_s20 = sshll.u32 (!%p151_p9), %s178_s19, 4  ;;  %s636_s27 = scalar_lea.sflag (!%p151_p9), [#allocation3], %s176_s10  ;;  %s650_s20 = int_to_ptr.vmem [resolvable:$true] %s649_s20 }
  0x13   : > { %v189_v0 = vld [vmem:[%s1035_s0] sm:$0xff]  ;;  %v193_v1 = vstv %s933_s16  ;;  %v190_v2 = vld [vmem:[%s1035_s0 + $0x8] sm:$0xff]  ;;  %v886_v4 = vmov 0   ;;  %vm198_vm1 = vcmask 1040384   ;;  %vm222_vm3 = vcmask 7168   ;;  %s180_s29 = scalar_select %p179_p10, %s933_s16, 1 }
  0x14   : > { %v191_v3 = vcvt.s32.f32 %v189_v0  ;;  %vm194_vm0 = vcmp.eq.s32.totalorder %v189_v0, %v193_v1  ;;  %823 = vset.pattern.permute.xlu0 %v886_v4  ;;  %822 = vset.pattern.permute.xlu1 %v886_v4  ;;  %vm195_vm2 = vcmp.eq.s32.totalorder %v190_v2, %v193_v1  ;;  %v192_v6 = vcvt.s32.f32 %v190_v2  ;;  %s824_s16 = scalar_lea.vmem %s650_s20, 128 }
  0x15   : > { %v196_v5 = vsel %vm194_vm0, 1, %v886_v4  ;;  %v197_v8 = vsel %vm195_vm2, 1, %v886_v4  ;;  %vm205_vm4 = vcmask 1041408   ;;  %vm212_vm5 = vcmask 1043456   ;;  %s744_s30 = sshll.u32 %s180_s29, 4  ;;  %p825_p11 = scmp.ne.s32.totalorder %s650_s20, %s824_s16 }
  0x16   : > { %256 = vrot.lane.b32.xlu0 %v191_v3, %s887_s28  ;;  %v199_v7 = vrot.slane %v196_v5, 7  ;;  %v223_v9 = vsel %vm222_vm3, %v196_v5, 0  ;;  %246 = vperm.xlu1 %822, %v197_v8   ;;  %v200_v10 = vrot.slane %v197_v8, 7  ;;  %v224_v11 = vsel %vm222_vm3, %v197_v8, 0  ;;  %s188_s6 = scalar_lea.vmem %s1037_s2, %s744_s30  ;;  %s183_s9 = scalar_lea.vmem %s1036_s1, %s744_s30 }
  0x17   : > { %v225_v13 = vadd.s32 %v224_v11, %v223_v9  ;;  %v888_v32 = vmov 0.0   ;;  %v371_v33 = vld [vmem:[%s188_s6] sm:$0xff]  ;;  %v372_v34 = vld [vmem:[%s188_s6 + $0x8] sm:$0xff]  ;;  %vm889_vm6 = vmmov 0   ;;  %v232_v47 = vlaneseq  ;;  %p826_p12 = pnand %p825_p11, %p950_p5 }
  0x18   : > { %v202_v12 = vsel %vm198_vm1, 0, %v199_v7  ;;  %v201_v15 = vsel %vm198_vm1, %v199_v7, %v200_v10  ;;  %755 = vmatprep.subr.mxu0 %v888_v32  ;;  %762 = vmatprep.subr.mxu1 %v888_v32  ;;  %v369_v35 = vld [vmem:[%s183_s9] sm:$0xff]  ;;  %v370_v36 = vld [vmem:[%s183_s9 + $0x8] sm:$0xff]  ;;  %v890_v52 = vmov 1.0   ;;  %vm294_vm13 = vcmask 130048  }
  0x19   : > { %v203_v14 = vadd.s32 %v202_v12, %v196_v5  ;;  %v204_v16 = vadd.s32 %v201_v15, %v197_v8  ;;  %v226_v37 = vrot.slane %v225_v13, 4  ;;  %759 = vmatprep.mubr.msk.f32.mxu0 %vm889_vm6, %v888_v32  ;;  %766 = vmatprep.mubr.msk.f32.mxu1 %vm889_vm6, %v888_v32  ;;  %v233_v49 = vand.u32 127, %v232_v47  ;;  %p827_p13 = pneg %p826_p12 }
  0x1a   : > { %258 = vrot.lane.b32.xlu0 %v192_v6, %s887_s28  ;;  %243 = vperm.xlu1 %822, %v196_v5   ;;  %v374_v54 = vshrl.u32 %v232_v47, 7  ;;  %vm601_vm1 = vcmask 59392   ;;  %vm627_vm3 = vcmask 1044480   ;;  %s891_s28 = smov [#allocation2]  }
  0x1b   : > { %v206_v17 = vrot.slane %v203_v14, 6  ;;  %v207_v18 = vrot.slane %v204_v16, 6  ;;  %v227_v38 = vadd.s32 %v226_v37, %v225_v13  ;;  %s828_s29 = sshll.u32 %s891_s28, 4  ;;  %s829_s29 = int_to_ptr.vmem [resolvable:$false] %s828_s29 }
  0x1c   : > { %v378_v57 = vsub.s32 1, %v374_v54  ;;  %v375_v60 = vadd.s32 8, %v374_v54  ;;  %v596_v0 = vsub.s32 0, %v374_v54  ;;  %s830_s30 = scalar_lea.vmem %s829_s29, 256  ;;  %p831_p0 = scmp.lt.s32.totalorder %s650_s20, %s829_s29 }
  0x1d   : > { %v209_v19 = vsel %vm205_vm4, 0, %v206_v17  ;;  %v208_v21 = vsel %vm205_vm4, %v206_v17, %v207_v18  ;;  %v228_v39 = vrot.slane %v227_v38, 2  ;;  %vm629_vm4 = vcmask 1045504   ;;  %p832_p1 = scmp.lt.s32.totalorder %s830_s30, %s824_s16 }
  0x1e   : > { %v210_v20 = vadd.s32 %v209_v19, %v203_v14  ;;  %v211_v22 = vadd.s32 %v208_v21, %v204_v16 }
  0x1f   : > { %v229_v40 = vadd.s32 %v228_v39, %v227_v38  ;;  %p833_p2 = por %p832_p1, %p831_p0 }
  0x20   : > { %v213_v23 = vrot.slane %v210_v20, 4  ;;  %v214_v24 = vrot.slane %v211_v22, 4 }
  0x21   : > { %v230_v41 = vrot.slane %v229_v40, 1  ;;  %p834_p3 = pnand %p833_p2, %p827_p13 }
  0x22   : > { %v216_v25 = vsel %vm212_vm5, 0, %v213_v23  ;;  %v215_v27 = vsel %vm212_vm5, %v213_v23, %v214_v24 }
  0x23   : > { %v217_v26 = vadd.s32 %v216_v25, %v210_v20  ;;  %v218_v28 = vadd.s32 %v215_v27, %v211_v22  ;;  %v231_v42 = vadd.s32 %v230_v41, %v229_v40 }
  0x25   : > { %v729_v29 = vadd.s32 4294967295, %v217_v26  ;;  %v219_v30 = vadd.s32 %v218_v28, %v217_v26  ;;  %v614_v43 = vcvt.s32.f32 %v231_v42 }
  0x27   : > { %235 = vperm.xlu0 %823, %v729_v29   ;;  %v730_v31 = vadd.s32 4294967295, %v219_v30 }
  0x29   : > { %238 = vperm.xlu1 %822, %v730_v31  }
  0x45   : > { %489 = vxpose.xlu0.b32.start [1/2] (short) (narrow) %v371_v33, 8 }
  0x49   : > { %490 = vxpose.xlu0.b32.end [2/2] (short) (narrow) %v372_v34, 8 }
  0x4d   : > { %384 = vxpose.xlu0.b32.start [1/2] (short) (narrow) %v369_v35, 8 }
  0x51   : > { %385 = vxpose.xlu0.b32.end [2/2] (short) (narrow) %v370_v36, 8 }
  0x7a   : > { %617 = vperm.xlu0 %823, %v614_v43  }
  0x88   : > { %v257_v44 = vpop.permute.xlu0 %256 }
  0x89   : > { %262 = vxpose.xlu1.b32.start [1/2] (short) (narrow) %v257_v44, 8 }
  0x8c   : > { %v259_v45 = vpop.permute.xlu0 %258 }
  0x8d   : > { %263 = vxpose.xlu1.b32.end [2/2] (short) (narrow) %v259_v45, 8 }
  0x91   : > { %v247_v46 = vpop.permute.xlu1 %246 }
  0x92   : > { %vm249_vm9 = vcmp.eq.s32.totalorder %v247_v46, 1 }
  0x95   : > { %v244_v48 = vpop.permute.xlu1 %243 }
  0x96   : > { %vm248_vm7 = vcmp.eq.s32.totalorder %v244_v48, 1 }
  0xa2   : > { %v236_v50 = vpop.permute.xlu0 %235 }
  0xa3   : > { %vm240_vm8 = vcmp.eq.s32.totalorder %v236_v50, %v233_v49 }
  0xa4   : > { %v239_v51 = vpop.permute.xlu1 %238  ;;  %vm250_vm11 = vmand %vm240_vm8, %vm248_vm7  ;;  %vm633_vm7 = vcmask 64512  }
  0xa5   : > { %vm241_vm10 = vcmp.eq.s32.totalorder %v239_v51, %v233_v49 }
  0xa6   : > { %vm251_vm12 = vmand %vm241_vm10, %vm249_vm9 }
  0xa7   : > { %756 = vmatpush3.msk.msra.mxu0 %vm251_vm12, %v890_v52 }
  0xa8   : > { %757 = vmatprep.subr.mxu0 %v888_v32 }
  0xa9   : > { %758 = vmatpush3.msk.msra.mxu0 %vm250_vm11, %v890_v52 }
  0xaa   : > { %769 = vmatprep.subr.mxu0 %v888_v32 }
  0xab   : > { %610 = vperm.xlu1 %822, %v231_v42  }
  0xc1   : > { %v505_v61 = vpop.trf.xlu0 }
  0xc9   : > { %v400_v63 = vpop.trf.xlu0 }
  0xf5   : > { %v618_v22 = vpop.permute.xlu0 %617 }
 0x105   : > { %v278_v53 = vpop.trf.xlu1 }
 0x106   : > { %760 = vmatmul.mubr.msk.f32.vlgmr.msra.gmra.mxu0 %vm294_vm13, %v278_v53 }
 0x107   : > { %773 = vmatprep.mubr.msk.f32.mxu0 %vm889_vm6, %v888_v32  ;;  %vm631_vm6 = vcmask 1046528  }
 0x126   : > { %v611_v10 = vpop.permute.xlu1 %610 }
 0x127   : > { %vm612_vm2 = vcmp.lt.s32.totalorder %v233_v49, %v611_v10 }
 0x128   : > { %v613_v14 = vsel %vm612_vm2, 1.0, %v888_v32 }
 0x1c6   : > { %v364_v55 = vpop.f32.mrf.mxu0 }
 0x1c7   : > { %v776_v56 = vtrunc.f32 %v364_v55  ;;  %v622_v16 = vmul.f32 %v613_v14, %v364_v55 }
 0x1c8   : > { %v761_v58 = vpop.f32.mrf.mxu0 }
 0x1c9   : > { %v777_v59 = vcvt.f32.s32 %v776_v56  ;;  %v624_v20 = vrot.slane %v622_v16, 3 }
 0x1cb   : > { %v379_v62 = vrot.slane %v777_v59, %v378_v57  ;;  %v597_v1 = vrot.slane %v777_v59, %v596_v0 }
 0x1cd   : > { %vm381_vm14 = vcmp.eq.s32.totalorder %v375_v60, %v379_v62  ;;  %vm380_vm15 = vcmp.eq.s32.totalorder %v374_v54, %v379_v62  ;;  %vm598_vm0 = vcmp.eq.s32.totalorder %v374_v54, %v597_v1 }
 0x1ce   : > { %763 = vmatpush3.msk.msra.mxu1 %vm381_vm14, %v890_v52  ;;  %770 = vmatpush3.msk.msra.mxu0 %vm381_vm14, %v890_v52  ;;  %v599_v4 = vsel %vm598_vm0, 1.0, %v888_v32 }
 0x1cf   : > { %764 = vmatprep.subr.mxu1 %v888_v32  ;;  %771 = vmatprep.subr.mxu0 %v888_v32 }
 0x1d0   : > { %765 = vmatpush3.msk.msra.mxu1 %vm380_vm15, %v890_v52  ;;  %772 = vmatpush3.msk.msra.mxu0 %vm380_vm15, %v890_v52 }
 0x1d1   : > { %767 = vmatmul.mubr.msk.f32.vlgmr.msra.gmra.mxu1 %vm294_vm13, %v400_v63  ;;  %774 = vmatmul.mubr.msk.f32.vlgmr.msra.gmra.mxu0 %vm294_vm13, %v505_v61 }
 0x291   : > { %v485_v2 = vpop.f32.mrf.mxu1  ;;  %v590_v3 = vpop.f32.mrf.mxu0 }
 0x292   : > { %v600_v5 = vmul.f32 %v599_v4, %v590_v3  ;;  %v620_v18 = vmul.f32 %v613_v14, %v485_v2 }
 0x293   : > { %v775_v6 = vpop.f32.mrf.mxu0  ;;  %v768_v7 = vpop.f32.mrf.mxu1 }
 0x294   : > { %v602_v8 = vsel %vm601_vm1, %v600_v5, 0.0 }
 0x295   : > { %v603_v9 = vrot.slane %v602_v8, 4 }
 0x297   : > { %v604_v11 = vadd.f32 %v603_v9, %v602_v8 }
 0x299   : > { %v605_v12 = vrot.slane %v604_v11, 2 }
 0x29b   : > { %v606_v13 = vadd.f32 %v605_v12, %v604_v11 }
 0x29d   : > { %v607_v15 = vrot.slane %v606_v13, 1 }
 0x29f   : > { %v608_v17 = vadd.f32 %v607_v15, %v606_v13 }
 0x2a1   : > { %v621_v19 = vmul.f32 %v613_v14, %v608_v17 }
 0x2a3   : > { %v626_v21 = vsel %vm212_vm5, %v620_v18, %v621_v19 }
 0x2a4   : > { %v628_v23 = vsel %vm627_vm3, %v626_v21, %v624_v20 }
 0x2a5   : > { %v630_v24 = vsel %vm629_vm4, %v628_v23, %v618_v22 }
 0x2a6   : > { %v632_v25 = vsel %vm631_vm6, %v630_v24, 0.0 }
 0x2a7   : > { %634 = vst.msk [vmem:[%s178_s19] sm:$0xff] %vm633_vm7, %v632_v25 }
 0x2a8   : > { %837 = shalt.err (!%p834_p3)
}
 0x2a9   : > { %s838_s4 = scalar_lea.hbm %s1000_s26, 128  ;;  %s842_s7 = scalar_lea.hbm %s1038_s3, 256 }
 0x2aa   : > { %p839_p4 = scmp.ne.s32.totalorder %s1000_s26, %s838_s4  ;;  %p843_p9 = scmp.lt.s32.totalorder %s1000_s26, %s1038_s3 }
 0x2ab   : > { %p844_p10 = scmp.lt.s32.totalorder %s842_s7, %s838_s4 }
 0x2ac   : > { %p840_p7 = pnand %p839_p4, %p950_p5 }
 0x2ad   : > { %p845_p11 = por %p844_p10, %p843_p9 }
 0x2ae   : > { %p841_p8 = pneg %p840_p7 }
 0x2b0   : > { %p846_p12 = pnand %p845_p11, %p841_p8 }
 0x2b2   : > { %849 = shalt.err (!%p846_p12)
}
 0x2b3   : > { %778 = dma.vmem_to_hbm [thread:$0]  (%p950_p5), %s650_s20, 128, %s1000_s26, %s636_s27  }
 0x2b4 PF: > { %p784_p13 = scmp.ge.s32.totalorder %s884_s15, 2  ;;  %s661_s10 = sand.u32 1, %s872_s12  }
 0x2b5   : > { %s662_s11 = scalar_lea.sflag [#allocation3], %s661_s10 }
 0x2b6   : > { %p781_p0 = pnand %p784_p13, %p954_p6 }
 0x2b8   : > { %p782_p1 = pneg %p781_p0 }
 0x2ba   : > { %867 = dma.done.wait (%p782_p1), %s662_s11, 128  }
 0x2bb   : > { %869 = vsyncadd (%p782_p1), %s662_s11, 4294967168  ;;  %p13_p2 = scmp.ge.s32.totalorder %s937_s18, 4   ;;  %s1041_s12 = smov %s876_s13 }
 0x2bc   : > { %s1042_s13 = smov %s880_s14  ;;  %s1043_s14 = smov %s948_s21 }
 0x2bd   : > { %s1044_s15 = smov %s937_s18  ;;  %15 = sbr.rel (!%p13_p2) target bundleno = 3 (0x3), region = 70 }
 0x2c2   :  { %667 = vsyncpa [#allocation3], 1 }
 0x2c3   :  { %669 = vsyncpa [#allocation3 + $0x1], 1 }

</bundles_post_ra>
